<compile_context>
chip_gen: v7x
topology: tpu7x:2x2x1
jax: 0.10.0
libtpu: 0.0.40
codegen_flags: <defaults>
</compile_context>

<pallas_src>
import jax
import jax.numpy as jnp
from jax.experimental import pallas as pl
from jax.experimental.pallas import tpu as pltpu

# ----- configuration mirroring CSDI_base.__init__ -----
BATCH      = 2
TARGET_DIM = 8            # K
SEQ_LEN    = 16           # L
EMB_TIME   = 32           # config['model']['timeemb']
EMB_FEAT   = 16           # config['model']['featureemb']
IS_COND    = False        # config['model']['is_conditional']
SIDE_DIM   = EMB_TIME + EMB_FEAT + (0 if IS_COND else 1)   # 49
NUM_STEPS  = 50
BETA_START = 1e-4
BETA_END   = 0.5
RATIO      = 0.7

N  = TARGET_DIM * SEQ_LEN                 # 128 positions per batch element
NP = ((N + 127) // 128) * 128             # lane-padded positions per batch element
NB = BATCH * NP                           # 256: batch packed into lanes

C_SIDE = ((SIDE_DIM + 7) // 8) * 8        # 56: side channels padded to sublane multiple

# rows of the packed (8, NB) vector operand
ROW_COEF_A, ROW_COEF_B, ROW_DATA, ROW_CMASK, ROW_OMASK, ROW_NOISE = range(6)


# ---------------------------------------------------------------------------
# Pallas kernel: fused noising + diffmodel stand-in + masked-MSE loss
# ---------------------------------------------------------------------------
def csdi_loss_kernel(w_in_ref, vec_ref, side_ref, w_side_ref, loss_ref):
    vec = vec_ref[...]                                 # (8, NB): one load, two vregs
    coef_a = vec[ROW_COEF_A:ROW_COEF_A + 1, :]         # sqrt(alpha_t) per lane
    coef_b = vec[ROW_COEF_B:ROW_COEF_B + 1, :]         # sqrt(1-alpha_t) per lane
    data   = vec[ROW_DATA:ROW_DATA + 1, :]
    cmask  = vec[ROW_CMASK:ROW_CMASK + 1, :]
    omask  = vec[ROW_OMASK:ROW_OMASK + 1, :]
    noise  = vec[ROW_NOISE:ROW_NOISE + 1, :]

    # noisy_data = sqrt(alpha_t) * x + sqrt(1-alpha_t) * eps
    noisy        = coef_a * data + coef_b * noise
    cond_obs     = cmask * data
    noisy_target = (1.0 - cmask) * noisy

    # TODO(synk): diff_CSDI (external diff_models.py) is not provided; a deterministic
    # per-position 1x1 conv over [side_info ; cond_obs ; noisy_target] + bias stands in.
    # Side channels go through the MXU; the two computed channels + bias stay on the VPU.
    pred_side = jnp.dot(w_side_ref[...], side_ref[...],
                        preferred_element_type=jnp.float32)        # (1,C_SIDE)x(C_SIDE,NB)
    predicted = (pred_side
                 + w_in_ref[0] * cond_obs
                 + w_in_ref[1] * noisy_target
                 + w_in_ref[2])

    # masked MSE: padded lanes carry omask = cmask = 0 so they drop out of num and den
    target_mask = omask - cmask
    residual    = (noise - predicted) * target_mask
    num = jnp.sum(residual * residual)
    den = jnp.sum(target_mask)
    loss_ref[0, 0] = num / jnp.where(den > 0.0, den, 1.0)


def _run_loss_kernel(w_in, vec, side, w_side):
    return pl.pallas_call(
        csdi_loss_kernel,
        out_shape=jax.ShapeDtypeStruct((1, 1), jnp.float32),
        in_specs=[
            pl.BlockSpec(memory_space=pltpu.MemorySpace.SMEM),   # (3,)  [w_cond, w_noisy, bias]
            pl.BlockSpec(memory_space=pltpu.MemorySpace.VMEM),   # (8, NB)      packed vectors
            pl.BlockSpec(memory_space=pltpu.MemorySpace.VMEM),   # (C_SIDE, NB) side info
            pl.BlockSpec(memory_space=pltpu.MemorySpace.VMEM),   # (1, C_SIDE)  side weights
        ],
        out_specs=pl.BlockSpec(memory_space=pltpu.MemorySpace.SMEM),
    )(w_in, vec, side, w_side)


# ---------------------------------------------------------------------------
# JAX glue reproducing CSDI_base helper methods
# ---------------------------------------------------------------------------
def time_embedding(pos, d_model):
    # pos: (B, L) float
    position = pos[:, :, None]                                     # (B, L, 1)
    div_term = 1.0 / jnp.power(
        10000.0, jnp.arange(0, d_model, 2, dtype=jnp.float32) / d_model)
    s = jnp.sin(position * div_term)                               # (B, L, d/2)
    c = jnp.cos(position * div_term)                               # (B, L, d/2)
    pe = jnp.stack([s, c], axis=-1).reshape(pos.shape[0], pos.shape[1], d_model)
    return pe                                                      # pe[...,0::2]=sin, 1::2=cos


def get_randmask(key, observed_mask, ratio):
    B = observed_mask.shape[0]
    rand = jax.random.uniform(key, observed_mask.shape, dtype=jnp.float32) * observed_mask
    flat = rand.reshape(B, -1)
    num_observed = observed_mask.reshape(B, -1).sum(axis=1)
    num_masked = jnp.round(num_observed * ratio).astype(jnp.int32)
    order = jnp.argsort(-flat, axis=1)          # descending ranks (topk indices)
    ranks = jnp.argsort(order, axis=1)
    flat = jnp.where(ranks < num_masked[:, None], -1.0, flat)
    return (flat > 0).reshape(observed_mask.shape).astype(jnp.float32)


def get_side_info(params, observed_tp, cond_mask):
    B, K, L = cond_mask.shape
    te = time_embedding(observed_tp, EMB_TIME)                     # (B, L, Te)
    te = jnp.broadcast_to(te[:, :, None, :], (B, L, K, EMB_TIME))
    fe = params['embed']                                           # (K, Tf)
    fe = jnp.broadcast_to(fe[None, None], (B, L, K, EMB_FEAT))
    side = jnp.concatenate([te, fe], axis=-1)                      # (B, L, K, Te+Tf)
    side = jnp.transpose(side, (0, 3, 2, 1))                       # (B, C, K, L)
    if not IS_COND:
        side = jnp.concatenate([side, cond_mask[:, None]], axis=1) # (B, C+1, K, L)
    return side.astype(jnp.float32)


def lane_flat(x):
    """(B, K, L) -> (1, B*NP): batch packed into lanes, each row zero-padded to NP."""
    x = x.reshape(BATCH, N).astype(jnp.float32)
    x = jnp.pad(x, ((0, 0), (0, NP - N)))
    return x.reshape(1, NB)


def csdi_forward(params, observed_data, observed_mask, observed_tp, key):
    """CSDI_base.forward(batch, is_train=1) -> scalar training loss."""
    B, K, L = observed_data.shape
    k_mask, k_t, k_noise = jax.random.split(key, 3)

    # target_strategy is forced to 'random' in forward()
    cond_mask = get_randmask(k_mask, observed_mask, RATIO)
    side_info = get_side_info(params, observed_tp, cond_mask)      # (B, SIDE_DIM, K, L)

    # diffusion schedule (linear)
    beta = jnp.linspace(BETA_START, BETA_END, NUM_STEPS)
    alpha = jnp.cumprod(1.0 - beta)
    t = jax.random.randint(k_t, (B,), 0, NUM_STEPS)
    alpha_t = alpha[t].astype(jnp.float32)                         # (B,)

    noise = jax.random.normal(k_noise, observed_data.shape, dtype=jnp.float32)

    # --- one lane-dense (8, NB) operand: all six per-position vectors in one DMA ---
    coef_a = jnp.repeat(jnp.sqrt(alpha_t), NP).reshape(1, NB)        # per-lane sqrt(alpha_t)
    coef_b = jnp.repeat(jnp.sqrt(1.0 - alpha_t), NP).reshape(1, NB)  # per-lane sqrt(1-alpha_t)
    vec = jnp.concatenate(
        [coef_a, coef_b,
         lane_flat(observed_data), lane_flat(cond_mask),
         lane_flat(observed_mask), lane_flat(noise),
         jnp.zeros((2, NB), dtype=jnp.float32)], axis=0)             # (8, NB)

    # side info, channel-major, lane-padded, channel-padded to C_SIDE rows
    side = side_info.reshape(B, SIDE_DIM, N)
    side = jnp.pad(side, ((0, 0), (0, 0), (0, NP - N)))
    side = jnp.transpose(side, (1, 0, 2)).reshape(SIDE_DIM, NB)
    side_f = jnp.pad(side, ((0, C_SIDE - SIDE_DIM), (0, 0)))         # (C_SIDE, NB)

    # side-channel weight row for the MXU dot; input weights + bias go to SMEM
    w_side = jnp.zeros((1, C_SIDE), dtype=jnp.float32)
    w_side = w_side.at[0, :SIDE_DIM].set(params['w_side'].astype(jnp.float32))
    w_in = params['w_in'].astype(jnp.float32)                        # (3,) [w_cond, w_noisy, bias]

    loss = _run_loss_kernel(w_in, vec, side_f, w_side)
    return loss[0, 0]


# ---------------------------------------------------------------------------
if __name__ == "__main__":
    key = jax.random.PRNGKey(0)
    kd, km, ke, kw1, kw2, kfwd = jax.random.split(key, 6)

    # synthetic batch (process_data equivalent)
    observed_data = jax.random.normal(kd, (BATCH, TARGET_DIM, SEQ_LEN), dtype=jnp.float32)
    observed_mask = (jax.random.uniform(km, (BATCH, TARGET_DIM, SEQ_LEN)) > 0.2
                     ).astype(jnp.float32)
    observed_tp = jnp.broadcast_to(
        jnp.arange(SEQ_LEN, dtype=jnp.float32), (BATCH, SEQ_LEN))

    # deterministic parameter init
    params = {
        'embed':  jax.random.normal(ke, (TARGET_DIM, EMB_FEAT), dtype=jnp.float32),  # nn.Embedding ~ N(0,1)
        'w_in':   0.1 * jax.random.normal(kw1, (3,), dtype=jnp.float32),   # [w_cond, w_noisy, bias]
        'w_side': 0.1 * jax.random.normal(kw2, (SIDE_DIM,), dtype=jnp.float32),
    }

    loss = jax.jit(csdi_forward)(params, observed_data, observed_mask, observed_tp, kfwd)
    jax.block_until_ready(loss)
    assert loss.shape == () and bool(jnp.isfinite(loss))
    print("KERNEL_OK")
</pallas_src>

<mosaic_0001>
module attributes {stable_mosaic.version = 11 : i64} {
  func.func @csdi_loss_kernel(%arg0: memref<3xf32, #tpu.memory_space<smem>>, %arg1: memref<8x256xf32, #tpu.memory_space<vmem>>, %arg2: memref<56x256xf32, #tpu.memory_space<vmem>>, %arg3: memref<1x56xf32, #tpu.memory_space<vmem>>, %arg4: memref<1x1xf32, #tpu.memory_space<smem>>) attributes {dimension_semantics = [], scalar_prefetch = 0 : i64, scratch_operands = 0 : i64, tpu.core_type = #tpu.core_type<tc>} {
    %c0 = arith.constant 0 : index
    %c0_0 = arith.constant 0 : index
    %0 = vector.load %arg1[%c0, %c0_0] : memref<8x256xf32, #tpu.memory_space<vmem>>, vector<8x256xf32>
    %1 = vector.extract_strided_slice %0 {offsets = [0, 0], sizes = [1, 256], strides = [1, 1]} : vector<8x256xf32> to vector<1x256xf32>
    %2 = vector.extract_strided_slice %0 {offsets = [1, 0], sizes = [1, 256], strides = [1, 1]} : vector<8x256xf32> to vector<1x256xf32>
    %3 = vector.extract_strided_slice %0 {offsets = [2, 0], sizes = [1, 256], strides = [1, 1]} : vector<8x256xf32> to vector<1x256xf32>
    %4 = vector.extract_strided_slice %0 {offsets = [3, 0], sizes = [1, 256], strides = [1, 1]} : vector<8x256xf32> to vector<1x256xf32>
    %5 = vector.extract_strided_slice %0 {offsets = [4, 0], sizes = [1, 256], strides = [1, 1]} : vector<8x256xf32> to vector<1x256xf32>
    %6 = vector.extract_strided_slice %0 {offsets = [5, 0], sizes = [1, 256], strides = [1, 1]} : vector<8x256xf32> to vector<1x256xf32>
    %7 = arith.mulf %1, %3 : vector<1x256xf32>
    %8 = arith.mulf %2, %6 : vector<1x256xf32>
    %9 = arith.addf %7, %8 : vector<1x256xf32>
    %10 = arith.mulf %4, %3 : vector<1x256xf32>
    %cst = arith.constant 1.000000e+00 : f32
    %11 = vector.broadcast %cst : f32 to vector<1x256xf32>
    %12 = arith.subf %11, %4 : vector<1x256xf32>
    %13 = arith.mulf %12, %9 : vector<1x256xf32>
    %c0_1 = arith.constant 0 : index
    %c0_2 = arith.constant 0 : index
    %14 = vector.load %arg3[%c0_1, %c0_2] : memref<1x56xf32, #tpu.memory_space<vmem>>, vector<1x56xf32>
    %c0_3 = arith.constant 0 : index
    %c0_4 = arith.constant 0 : index
    %15 = vector.load %arg2[%c0_3, %c0_4] : memref<56x256xf32, #tpu.memory_space<vmem>>, vector<56x256xf32>
    %cst_5 = arith.constant dense<0.000000e+00> : vector<1x256xf32>
    %16 = tpu.matmul %14, %15, %cst_5 {dimension_numbers = #tpu.dot_dimension_numbers<[1], [0], [0], [1], [0, 0, 1, 1], [], []>} : vector<1x56xf32>, vector<56x256xf32>, vector<1x256xf32> -> vector<1x256xf32>
    %c0_6 = arith.constant 0 : index
    %17 = memref.load %arg0[%c0_6] : memref<3xf32, #tpu.memory_space<smem>>
    %18 = vector.broadcast %17 : f32 to vector<1x256xf32>
    %19 = arith.mulf %18, %10 : vector<1x256xf32>
    %20 = arith.addf %16, %19 : vector<1x256xf32>
    %c1 = arith.constant 1 : index
    %21 = memref.load %arg0[%c1] : memref<3xf32, #tpu.memory_space<smem>>
    %22 = vector.broadcast %21 : f32 to vector<1x256xf32>
    %23 = arith.mulf %22, %13 : vector<1x256xf32>
    %24 = arith.addf %20, %23 : vector<1x256xf32>
    %c2 = arith.constant 2 : index
    %25 = memref.load %arg0[%c2] : memref<3xf32, #tpu.memory_space<smem>>
    %26 = vector.broadcast %25 : f32 to vector<1x256xf32>
    %27 = arith.addf %24, %26 : vector<1x256xf32>
    %28 = arith.subf %5, %4 : vector<1x256xf32>
    %29 = arith.subf %6, %27 : vector<1x256xf32>
    %30 = arith.mulf %29, %28 : vector<1x256xf32>
    %31 = arith.mulf %30, %30 : vector<1x256xf32>
    %32 = vector.shape_cast %31 : vector<1x256xf32> to vector<1x1x256xf32>
    %cst_7 = arith.constant dense<0.000000e+00> : vector<1xf32>
    %33 = vector.multi_reduction <add>, %32, %cst_7 [1, 2] : vector<1x1x256xf32> to vector<1xf32>
    %34 = vector.shape_cast %33 : vector<1xf32> to vector<1x1x1xf32>
    %35 = vector.extract %34[0, 0, 0] : f32 from vector<1x1x1xf32>
    %36 = vector.shape_cast %28 : vector<1x256xf32> to vector<1x1x256xf32>
    %cst_8 = arith.constant dense<0.000000e+00> : vector<1xf32>
    %37 = vector.multi_reduction <add>, %36, %cst_8 [1, 2] : vector<1x1x256xf32> to vector<1xf32>
    %38 = vector.shape_cast %37 : vector<1xf32> to vector<1x1x1xf32>
    %39 = vector.extract %38[0, 0, 0] : f32 from vector<1x1x1xf32>
    %cst_9 = arith.constant 0.000000e+00 : f32
    %40 = arith.cmpf ogt, %39, %cst_9 : f32
    %cst_10 = arith.constant 1.000000e+00 : f32
    %41 = arith.select %40, %39, %cst_10 : f32
    %42 = arith.divf %35, %41 : f32
    %c0_11 = arith.constant 0 : index
    %c0_12 = arith.constant 0 : index
    %43 = memref.load %arg4[%c0_11, %c0_12] : memref<1x1xf32, #tpu.memory_space<smem>>
    memref.store %42, %arg4[%c0_11, %c0_12] : memref<1x1xf32, #tpu.memory_space<smem>>
    return
  }
}

</mosaic_0001>

<bundles_post_ra>
// kernel: neg.1
= control target key start
LH: loop header
LB: loop body
LE: loop exit
PB: predicated region body
PF: predicated region fallthrough
CT: control target
= control target key end

     0   :  { %s24_s0 = inlined_call_operand.vmem [shape: f32[2,128], index: 0, kind: input, shape index: {}]   ;;  %s25_s1 = inlined_call_operand.vmem [shape: f32[2,128], index: 1, kind: output, shape index: {}]  }
   0x1   :  { %v2_v0 = vld [vmem:[%s24_s0] sm:$0x3] }
   0x2   :  { %v5_v1 = vxor.u32 2147483648, %v2_v0 }
   0x4   :  { %7 = vst [vmem:[%s25_s1] sm:$0x3] %v5_v1 }

// kernel: csdi_forward.3
= control target key start
LH: loop header
LB: loop body
LE: loop exit
PB: predicated region body
PF: predicated region fallthrough
CT: control target
= control target key end

     0   :  { %9 = vsyncpa [#allocation4], 0  ;;  %s410_s0 = inlined_call_operand.vmem [shape: f32[3], index: 0, kind: input, shape index: {}]   ;;  %s411_s1 = inlined_call_operand.vmem [shape: f32[8,256], index: 1, kind: input, shape index: {}]   ;;  %s412_s2 = inlined_call_operand.vmem [shape: f32[56,256], index: 2, kind: input, shape index: {}]   ;;  %s413_s3 = inlined_call_operand.vmem [shape: f32[1,56], index: 3, kind: input, shape index: {}]   ;;  %s414_s4 = inlined_call_operand.hbm [shape: f32[1,1], index: 4, kind: output, shape index: {}]  }
   0x1   :  { %10 = vsyncpa [#allocation3], 0  ;;  %s17_s17 = sshll.u32 %s410_s0, 4  ;;  %s18_s17 = int_to_ptr.vmem [resolvable:$true] %s17_s17 }
   0x2   :  { %s290_s18 = scalar_lea.vmem %s18_s17, 16  ;;  %p295_p1 = scmp.lt.s32.totalorder %s18_s17, %s18_s17 }
   0x3   :  { %p291_p0 = scmp.ne.s32.totalorder %s18_s17, %s290_s18  ;;  %p296_p2 = scmp.lt.s32.totalorder %s290_s18, %s290_s18 }
   0x5   :  { %p297_p3 = por %p296_p2, %p295_p1 }
   0x7   :  { %p298_p4 = pnand %p297_p3, %p291_p0 }
   0x9   :  { %301 = shalt.err (!%p298_p4)
}
   0xa   :  { %s316_s19 = smov [#allocation2]  }
   0xb   :  { %20 = dma.vmem_to_smem %s18_s17, 16, %s316_s19, [#allocation4]  }
   0xc   :  { %312 = dma.done.wait [#allocation4], 16  }
   0xd   :  { %313 = vsyncadd [#allocation4], 4294967280 }
   0xe   :  { %30 = sfence }
   0xf   :  { %v73_v0 = vld [vmem:[%s412_s2 + $0x8] sm:$0xff]  ;;  %v75_v1 = vld [vmem:[%s412_s2 + $0x18] sm:$0xff]  ;;  %v72_v2 = vld [vmem:[%s412_s2] sm:$0xff]  ;;  %v317_v7 = vmov 0.0   ;;  %vm96_vm0 = vcmask 457728   ;;  %vm213_vm1 = vcmask 1040384  }
  0x10   :  { %v267_v3 = vpack.c.bf16 %v75_v1, %v73_v0  ;;  %v74_v4 = vld [vmem:[%s412_s2 + $0x10] sm:$0xff]  ;;  %v77_v5 = vld [vmem:[%s412_s2 + $0x28] sm:$0xff]  ;;  %v79_v6 = vld [vmem:[%s412_s2 + $0x38] sm:$0xff]  ;;  %164 = vmatprep.mubr.f32.mxu0 %v317_v7  ;;  %s302_s6 = scalar_lea.hbm %s414_s4, 16 }
  0x11   :  { %v269_v8 = vpack.c.bf16 %v74_v4, %v72_v2  ;;  %v271_v9 = vpack.c.bf16 %v79_v6, %v77_v5  ;;  %v76_v10 = vld [vmem:[%s412_s2 + $0x20] sm:$0xff]  ;;  %v78_v11 = vld [vmem:[%s412_s2 + $0x30] sm:$0xff]  ;;  %v81_v12 = vld [vmem:[%s412_s2 + $0x48] sm:$0xff]  ;;  %p303_p6 = scmp.ne.s32.totalorder %s414_s4, %s302_s6  ;;  %p306_p7 = scmp.lt.u32.totalorder %s302_s6, %s414_s4 }
  0x12   :  { %268 = vmatprep.subr.bf16.mxu0 %v267_v3  ;;  %v83_v13 = vld [vmem:[%s412_s2 + $0x58] sm:$0xff]  ;;  %v273_v14 = vpack.c.bf16 %v78_v11, %v76_v10  ;;  %v80_v16 = vld [vmem:[%s412_s2 + $0x40] sm:$0xff]  ;;  %v82_v17 = vld [vmem:[%s412_s2 + $0x50] sm:$0xff] }
  0x13   :  { %270 = vmatpush1.bf16.msra.mxu0 %v269_v8  ;;  %v275_v15 = vpack.c.bf16 %v83_v13, %v81_v12  ;;  %v277_v18 = vpack.c.bf16 %v82_v17, %v80_v16  ;;  %v85_v19 = vld [vmem:[%s412_s2 + $0x68] sm:$0xff]  ;;  %v84_v20 = vld [vmem:[%s412_s2 + $0x60] sm:$0xff]  ;;  %s86_s2 = sld [smem:[#allocation2]]  ;;  %p308_p8 = pnand %p306_p7, %p303_p6 }
  0x14   :  { %272 = vmatprep.subr.bf16.mxu0 %v271_v9  ;;  %v71_v21 = vld [vmem:[%s413_s3] sm:$0x1]  ;;  %v32_v23 = vld [vmem:[%s411_s1 + $0x8] sm:$0xff]  ;;  %s265_s3 = sld [smem:[#allocation2 + $0x1]] }
  0x15   :  { %v31_v22 = vld [vmem:[%s411_s1] sm:$0xff]  ;;  %v42_v25 = vrot.slane %v32_v23, 4  ;;  %v36_v28 = vrot.slane %v32_v23, 2  ;;  %v56_v37 = vrot.slane %v32_v23, 7  ;;  %v62_v40 = vsub.f32 1.0, %v32_v23  ;;  %s266_s1 = sld [smem:[#allocation2 + $0x2]] }
  0x16   :  { %v41_v24 = vrot.slane %v31_v22, 4  ;;  %v35_v26 = vrot.slane %v31_v22, 2  ;;  %v55_v36 = vrot.slane %v31_v22, 7  ;;  %v61_v38 = vsub.f32 1.0, %v31_v22 }
  0x17   :  { %274 = vmatpush1.bf16.msra.mxu0 %v273_v14  ;;  %v46_v29 = vmul.f32 %v42_v25, %v32_v23  ;;  %v40_v32 = vmul.f32 %v36_v28, %v32_v23  ;;  %v60_v44 = vmul.f32 %v56_v37, %v32_v23  ;;  %v188_v0 = vsub.f32 %v32_v23, %v56_v37 }
  0x18   :  { %276 = vmatprep.subr.bf16.mxu0 %v275_v15  ;;  %v45_v27 = vmul.f32 %v41_v24, %v31_v22  ;;  %v39_v30 = vmul.f32 %v35_v26, %v31_v22  ;;  %v59_v42 = vmul.f32 %v55_v36, %v31_v22  ;;  %v187_v62 = vsub.f32 %v31_v22, %v55_v36 }
  0x19   :  { %v50_v33 = vrot.slane %v46_v29, 1  ;;  %v87_v43 = vstv %s86_s2  ;;  %v200_v6 = vrot.slane %v188_v0, 7  ;;  %v227_v14 = vrot.slane %v188_v0, 4 }
  0x1a   :  { %v49_v31 = vrot.slane %v45_v27, 1  ;;  %v172_v46 = vstv %s265_s3  ;;  %v88_v48 = vmul.f32 %v87_v43, %v59_v42  ;;  %v89_v49 = vmul.f32 %v87_v43, %v60_v44 }
  0x1b   :  { %278 = vmatpush1.bf16.msra.mxu0 %v277_v18  ;;  %v54_v35 = vadd.f32 %v50_v33, %v40_v32  ;;  %v184_v59 = vstv %s266_s1  ;;  %v199_v4 = vrot.slane %v187_v62, 7  ;;  %v226_v13 = vrot.slane %v187_v62, 4 }
  0x1c   :  { %112 = vmatprep.subr.mxu0 %v85_v19  ;;  %v53_v34 = vadd.f32 %v49_v31, %v39_v30  ;;  %v92_v52 = vrot.slane %v88_v48, 3  ;;  %v93_v53 = vrot.slane %v89_v49, 3 }
  0x1d   :  { %v66_v41 = vrot.slane %v54_v35, 5  ;;  %v230_v19 = vsel %vm213_vm1, %v226_v13, 0.0 }
  0x1e   :  { %v65_v39 = vrot.slane %v53_v34, 5 }
  0x1f   :  { %113 = vmatpush1.msra.mxu0 %v84_v20  ;;  %v70_v47 = vmul.f32 %v66_v41, %v62_v40  ;;  %v231_v20 = vsel %vm213_vm1, %v227_v14, 0.0 }
  0x20   :  { %264 = vmatmul.mubr.msk.f32.vlgmr.msra.gmra.mrb[0].mxu0 %vm96_vm0, %v71_v21  ;;  %v69_v45 = vmul.f32 %v65_v39, %v61_v38  ;;  %v232_v24 = vadd.f32 %v231_v20, %v230_v19 }
  0x21   :  { %v174_v51 = vmul.f32 %v172_v46, %v70_v47 }
  0x22   :  { %v173_v50 = vmul.f32 %v172_v46, %v69_v45 }
  0x23   :  { %v178_v56 = vrot.slane %v174_v51, 3 }
  0x24   :  { %v177_v54 = vrot.slane %v173_v50, 3 }
  0xf3   :  { %v166_v55 = vpop.f32.mrb[0].mxu0 }
  0xf4   :  { %v167_v57 = vadd.f32 %v166_v55, %v92_v52  ;;  %v168_v58 = vpop.f32.mrb[1].mxu0 }
  0xf5   :  { %v169_v60 = vadd.f32 %v168_v58, %v93_v53 }
  0xf6   :  { %v181_v61 = vadd.f32 %v177_v54, %v167_v57 }
  0xf7   :  { %v182_v63 = vadd.f32 %v178_v56, %v169_v60 }
  0xf8   :  { %v185_v1 = vadd.f32 %v184_v59, %v181_v61 }
  0xf9   :  { %v186_v2 = vadd.f32 %v184_v59, %v182_v63 }
  0xfa   :  { %v191_v3 = vrot.slane %v185_v1, 3 }
  0xfb   :  { %v192_v5 = vrot.slane %v186_v2, 3 }
  0xfc   :  { %v195_v7 = vsub.f32 %v31_v22, %v191_v3 }
  0xfd   :  { %v196_v8 = vsub.f32 %v32_v23, %v192_v5 }
  0xfe   :  { %v203_v9 = vmul.f32 %v199_v4, %v195_v7 }
  0xff   :  { %v204_v10 = vmul.f32 %v200_v6, %v196_v8 }
 0x100   :  { %v205_v11 = vmul.f32 %v203_v9, %v203_v9 }
 0x101   :  { %v206_v12 = vmul.f32 %v204_v10, %v204_v10 }
 0x102   :  { %v209_v15 = vrot.slane %v205_v11, 5 }
 0x103   :  { %v210_v16 = vrot.slane %v206_v12, 5 }
 0x104   :  { %v214_v17 = vsel %vm213_vm1, %v209_v15, 0.0 }
 0x105   :  { %v215_v18 = vsel %vm213_vm1, %v210_v16, 0.0 }
 0x106   :  { %v216_v21 = vadd.f32 %v215_v18, %v214_v17 }
 0x108   :  { %217 = vadd.xlane.f32.xlu0 %v216_v21 }
 0x10c   :  { %233 = vadd.xlane.f32.xlu0 %v232_v24 }
 0x195   :  { %v218_v25 = vpop.xlane.xlu0 %217 }
 0x196   :  { %v219_v22 = vrot.slane %v218_v25, 4 }
 0x198   :  { %v220_v23 = vadd.f32 %v219_v22, %v218_v25 }
 0x199   :  { %v234_v26 = vpop.xlane.xlu0 %233 }
 0x19a   :  { %v221_v27 = vrot.slane %v220_v23, 2  ;;  %v235_v28 = vrot.slane %v234_v26, 4 }
 0x19c   :  { %v236_v29 = vadd.f32 %v235_v28, %v234_v26  ;;  %v222_v30 = vadd.f32 %v221_v27, %v220_v23 }
 0x19e   :  { %v237_v31 = vrot.slane %v236_v29, 2  ;;  %v223_v32 = vrot.slane %v222_v30, 1 }
 0x1a0   :  { %v238_v33 = vadd.f32 %v237_v31, %v236_v29  ;;  %v224_v34 = vadd.f32 %v223_v32, %v222_v30 }
 0x1a2   :  { %279 = vpush %v224_v34  ;;  %v239_v35 = vrot.slane %v238_v33, 1 }
 0x1a4   :  { %v240_v36 = vadd.f32 %v239_v35, %v238_v33 }
 0x1a6   :  { %281 = vpush %v240_v36 }
 0x1d3   :  { %s280_s26 = spop %279 }
 0x1d7   :  { %s282_s27 = spop %281 }
 0x1d8   :  { %p242_p5 = scmp.gt.f32.partialorder %s282_s27, 0.0 }
 0x1da   :  { %s416_s27 = smov (!%p242_p5, %s282_s27), 1.0 }
 0x1db   :  { %v244_v37 = vstv %s416_s27 }
 0x1dc   :  { %288 = vrcp.f32 %v244_v37 }
 0x1e6   :  { %v289_v38 = vpop.eup %288 }
 0x1e7   :  { %283 = vpush %v289_v38 }
 0x218   :  { %s284_s28 = spop %283 }
 0x219   :  { %s247_s29 = smul.f32 %s284_s28, %s280_s26 }
 0x21b   :  { %249 = sst [smem:[#allocation5]] %s247_s29 }
 0x21c   :  { %311 = shalt.err (!%p308_p8)
}
 0x21d   :  { %s318_s11 = smov [#allocation5]  }
 0x21e   :  { %257 = dma.smem_to_hbm %s318_s11, 16, %s414_s4, [#allocation3]  }
 0x21f   :  { %314 = dma.done.wait [#allocation3], 16  }
 0x220   :  { %315 = vsyncadd [#allocation3], 4294967280 }
 0x221   :  { %261 = sfence }
 0x222   :  { %262 = vsyncpa [#allocation3], 1 }
 0x223   :  { %263 = vsyncpa [#allocation4], 1 }

</bundles_post_ra>
